<compile_context>
chip_gen: v7x
topology: tpu7x:2x2x1
jax: 0.10.0
libtpu: 0.0.40
codegen_flags: <defaults>
</compile_context>

<pallas_src>
import jax
import jax.numpy as jnp
from jax.experimental import pallas as pl
from jax.experimental.pallas import tpu as pltpu


def cnn_fused_kernel(x_ref, w1_ref, b1_ref, w2_ref, b2_ref, w3_ref, b3_ref,
                     out_ref):
    """Fused conv1+ReLU+maxpool+conv2(1x1)+ReLU+flatten+linear for one batch tile.

    x_ref : (2*T2, TILE_N, C*K)  im2col taps; leading index = (even/odd, t)
    w1_ref: (C*K, 8)             conv1 weight in im2col layout
    b1_ref: (1, 8)
    w2_ref: (8, 8)               conv2 (1x1) weight
    b2_ref: (1, 8)
    w3_ref: (T2*8, 64)           linear weight, pre-permuted to time-major rows
    b3_ref: (1, 64)
    out_ref:(TILE_N, 64)
    """
    two_t2, TN, CK = x_ref.shape
    T2 = two_t2 // 2
    C2 = w2_ref.shape[1]
    O3 = out_ref.shape[1]
    R = T2 * TN

    # conv1 (even and odd output positions) as a single stacked MXU matmul.
    # The reshape is a tile-aligned leading-dim collapse (TN % 8 == 0) -> free.
    x2 = x_ref[...].reshape(2 * R, CK)
    h = jnp.dot(x2, w1_ref[...], preferred_element_type=jnp.float32)
    h = jnp.maximum(h + b1_ref[...], 0.0)

    # MaxPool1d(kernel=2, stride=2): elementwise max of even / odd halves.
    p = jnp.maximum(h[:R], h[R:])

    # Conv1d(8,8,k=1) == per-timestep channel matmul, + bias + ReLU.
    h2 = jnp.dot(p, w2_ref[...], preferred_element_type=jnp.float32)
    h2 = jnp.maximum(h2 + b2_ref[...], 0.0)

    # Flatten + Linear(120,64). The PyTorch channel-major flatten is folded
    # into the (one-time) weight permutation, so here it is just a sum over T2
    # small matmuls on sublane-aligned static row slices — no activation
    # relayout inside the kernel.
    acc = jnp.zeros((TN, O3), jnp.float32) + b3_ref[...]
    for t in range(T2):
        acc = acc + jnp.dot(h2[t * TN:(t + 1) * TN, :],
                            w3_ref[t * C2:(t + 1) * C2, :],
                            preferred_element_type=jnp.float32)
    out_ref[...] = acc


def cnn_forward(x, params, *, tile_n=None):
    """x: (N, 4, L) float32 with 8 * ((L - 9) // 2) == 120  (i.e. L in {39, 40})."""
    w1, b1, w2, b2, w3, b3 = params
    N, C, L = x.shape
    K = w1.shape[2]                     # 10
    O1 = w1.shape[0]                    # 8
    O3 = w3.shape[0]                    # 64
    T1 = L - K + 1                      # conv1 output length
    T2 = T1 // 2                        # pooled length (15)
    assert O1 * T2 == w3.shape[1], "input length inconsistent with Linear(120,64)"

    if tile_n is None:
        tile_n = 8 if N <= 8 else 64    # rows multiple of 8; modest VMEM per tile
    n_pad = pl.cdiv(N, tile_n) * tile_n
    xp = x if n_pad == N else jnp.pad(x, ((0, n_pad - N), (0, 0), (0, 0)))

    # ---- glue (XLA, tiny): even/odd im2col, rows ordered (t, n) per tile.
    idx = 2 * jnp.arange(T2)[:, None] + jnp.arange(K)[None, :]   # (T2, K)

    def im2col(offset):
        g = xp[:, :, idx + offset]            # (n_pad, C, T2, K)
        g = jnp.transpose(g, (2, 0, 1, 3))    # (T2, n_pad, C, K)
        return g.reshape(T2, n_pad, C * K)

    x_stacked = jnp.concatenate([im2col(0), im2col(1)], axis=0)  # (2*T2, n_pad, C*K)
    # TODO(synk): for very large N, build the taps in-kernel from raw x to cut
    # the ~7.5x im2col HBM read amplification.

    # ---- one-time weight permutations (weights, not activations).
    w1f = jnp.transpose(w1, (1, 2, 0)).reshape(C * K, O1)        # (C*K, 8)
    w2f = w2[:, :, 0].T                                          # (8, 8)
    # w3r[t*8 + c, o] = w3[o, c*T2 + t]  (time-major flatten folded into weight)
    w3r = w3.reshape(O3, O1, T2).transpose(2, 1, 0).reshape(T2 * O1, O3)

    out = pl.pallas_call(
        cnn_fused_kernel,
        out_shape=jax.ShapeDtypeStruct((n_pad, O3), jnp.float32),
        grid=(n_pad // tile_n,),
        in_specs=[
            pl.BlockSpec((2 * T2, tile_n, C * K), lambda i: (0, i, 0)),
            pl.BlockSpec((C * K, O1), lambda i: (0, 0)),
            pl.BlockSpec((1, O1), lambda i: (0, 0)),
            pl.BlockSpec((O1, O1), lambda i: (0, 0)),
            pl.BlockSpec((1, O1), lambda i: (0, 0)),
            pl.BlockSpec((T2 * O1, O3), lambda i: (0, 0)),
            pl.BlockSpec((1, O3), lambda i: (0, 0)),
        ],
        out_specs=pl.BlockSpec((tile_n, O3), lambda i: (i, 0)),
        compiler_params=pltpu.CompilerParams(
            dimension_semantics=("parallel",)),
    )(x_stacked, w1f, b1.reshape(1, O1), w2f, b2.reshape(1, O1),
      w3r, b3.reshape(1, O3))
    return out[:N]


def reference_forward(x, params):
    """Pure-JAX reference mirroring the PyTorch module exactly."""
    w1, b1, w2, b2, w3, b3 = params
    N, C, L = x.shape
    K = 10
    T1 = L - K + 1
    idx = jnp.arange(T1)[:, None] + jnp.arange(K)[None, :]
    windows = x[:, :, idx]                                      # (N, C, T1, K)
    c1 = jnp.einsum("nctk,ock->not", windows, w1) + b1[:, None]
    c1 = jnp.maximum(c1, 0.0)
    T2 = T1 // 2
    p = c1[:, :, : 2 * T2].reshape(N, 8, T2, 2).max(-1)         # MaxPool1d(2)
    c2 = jnp.einsum("nct,oc->not", p, w2[:, :, 0]) + b2[:, None]
    c2 = jnp.maximum(c2, 0.0)
    flat = c2.reshape(N, 8 * T2)
    return flat @ w3.T + b3


def init_params(key):
    k1, k2, k3, k4, k5, k6 = jax.random.split(key, 6)
    w1 = jax.random.normal(k1, (8, 4, 10), jnp.float32) * 0.1   # Conv1d(4,8,10)
    b1 = jax.random.normal(k2, (8,), jnp.float32) * 0.1
    w2 = jax.random.normal(k3, (8, 8, 1), jnp.float32) * 0.1    # Conv1d(8,8,1)
    b2 = jax.random.normal(k4, (8,), jnp.float32) * 0.1
    w3 = jax.random.normal(k5, (64, 120), jnp.float32) * 0.1    # Linear(120,64)
    b3 = jax.random.normal(k6, (64,), jnp.float32) * 0.1
    return (w1, b1, w2, b2, w3, b3)


if __name__ == "__main__":
    key = jax.random.PRNGKey(0)
    pkey, xkey = jax.random.split(key)
    params = init_params(pkey)
    # L=40 -> conv1 out 31 -> pool 15 -> flatten 8*15=120 (matches Linear(120,64))
    x = jax.random.normal(xkey, (2, 4, 40), jnp.float32)

    fwd = jax.jit(cnn_forward)
    out = jax.block_until_ready(fwd(x, params))
    assert out.shape == (2, 64), out.shape

    ref = reference_forward(x, params)
    assert jnp.allclose(out, ref, atol=1e-4, rtol=1e-4), "mismatch vs reference"

    print("KERNEL_OK")
</pallas_src>

<mosaic_0001>
module attributes {stable_mosaic.version = 11 : i64} {
  func.func @cnn_fused_kernel(%arg0: i32, %arg1: memref<30x8x40xf32, #tpu.memory_space<vmem>>, %arg2: memref<40x8xf32, #tpu.memory_space<vmem>>, %arg3: memref<1x8xf32, #tpu.memory_space<vmem>>, %arg4: memref<8x8xf32, #tpu.memory_space<vmem>>, %arg5: memref<1x8xf32, #tpu.memory_space<vmem>>, %arg6: memref<120x64xf32, #tpu.memory_space<vmem>>, %arg7: memref<1x64xf32, #tpu.memory_space<vmem>>, %arg8: memref<8x64xf32, #tpu.memory_space<vmem>>) attributes {dimension_semantics = [#tpu.dimension_semantics<parallel>], iteration_bounds = array<i64: 1>, scalar_prefetch = 0 : i64, scratch_operands = 0 : i64, tpu.core_type = #tpu.core_type<tc>, window_params = [{transform_indices = @transform_0, window_bounds = array<i64: 30, 8, 40>}, {pipeline_mode = #tpu.pipeline_mode<synchronous>, transform_indices = @transform_1, window_bounds = array<i64: 40, 8>}, {pipeline_mode = #tpu.pipeline_mode<synchronous>, transform_indices = @transform_2, window_bounds = array<i64: 1, 8>}, {pipeline_mode = #tpu.pipeline_mode<synchronous>, transform_indices = @transform_3, window_bounds = array<i64: 8, 8>}, {pipeline_mode = #tpu.pipeline_mode<synchronous>, transform_indices = @transform_4, window_bounds = array<i64: 1, 8>}, {pipeline_mode = #tpu.pipeline_mode<synchronous>, transform_indices = @transform_5, window_bounds = array<i64: 120, 64>}, {pipeline_mode = #tpu.pipeline_mode<synchronous>, transform_indices = @transform_6, window_bounds = array<i64: 1, 64>}, {transform_indices = @transform_7, window_bounds = array<i64: 8, 64>}]} {
    %c0 = arith.constant 0 : index
    %c0_0 = arith.constant 0 : index
    %c0_1 = arith.constant 0 : index
    %0 = vector.load %arg1[%c0, %c0_0, %c0_1] : memref<30x8x40xf32, #tpu.memory_space<vmem>>, vector<30x8x40xf32>
    %1 = vector.shape_cast %0 : vector<30x8x40xf32> to vector<240x40xf32>
    %c0_2 = arith.constant 0 : index
    %c0_3 = arith.constant 0 : index
    %2 = vector.load %arg2[%c0_2, %c0_3] : memref<40x8xf32, #tpu.memory_space<vmem>>, vector<40x8xf32>
    %cst = arith.constant dense<0.000000e+00> : vector<240x8xf32>
    %3 = tpu.matmul %1, %2, %cst {dimension_numbers = #tpu.dot_dimension_numbers<[1], [0], [0], [1], [0, 0, 1, 1], [], []>} : vector<240x40xf32>, vector<40x8xf32>, vector<240x8xf32> -> vector<240x8xf32>
    %c0_4 = arith.constant 0 : index
    %c0_5 = arith.constant 0 : index
    %4 = vector.load %arg3[%c0_4, %c0_5] : memref<1x8xf32, #tpu.memory_space<vmem>>, vector<1x8xf32>
    %5 = vector.broadcast %4 : vector<1x8xf32> to vector<240x8xf32>
    %6 = arith.addf %3, %5 : vector<240x8xf32>
    %cst_6 = arith.constant 0.000000e+00 : f32
    %7 = vector.broadcast %cst_6 : f32 to vector<240x8xf32>
    %8 = arith.maximumf %6, %7 : vector<240x8xf32>
    %9 = vector.extract_strided_slice %8 {offsets = [0, 0], sizes = [120, 8], strides = [1, 1]} : vector<240x8xf32> to vector<120x8xf32>
    %10 = vector.extract_strided_slice %8 {offsets = [120, 0], sizes = [120, 8], strides = [1, 1]} : vector<240x8xf32> to vector<120x8xf32>
    %11 = arith.maximumf %9, %10 : vector<120x8xf32>
    %c0_7 = arith.constant 0 : index
    %c0_8 = arith.constant 0 : index
    %12 = vector.load %arg4[%c0_7, %c0_8] : memref<8x8xf32, #tpu.memory_space<vmem>>, vector<8x8xf32>
    %cst_9 = arith.constant dense<0.000000e+00> : vector<120x8xf32>
    %13 = tpu.matmul %11, %12, %cst_9 {dimension_numbers = #tpu.dot_dimension_numbers<[1], [0], [0], [1], [0, 0, 1, 1], [], []>} : vector<120x8xf32>, vector<8x8xf32>, vector<120x8xf32> -> vector<120x8xf32>
    %c0_10 = arith.constant 0 : index
    %c0_11 = arith.constant 0 : index
    %14 = vector.load %arg5[%c0_10, %c0_11] : memref<1x8xf32, #tpu.memory_space<vmem>>, vector<1x8xf32>
    %15 = vector.broadcast %14 : vector<1x8xf32> to vector<120x8xf32>
    %16 = arith.addf %13, %15 : vector<120x8xf32>
    %cst_12 = arith.constant 0.000000e+00 : f32
    %17 = vector.broadcast %cst_12 : f32 to vector<120x8xf32>
    %18 = arith.maximumf %16, %17 : vector<120x8xf32>
    %cst_13 = arith.constant 0.000000e+00 : f32
    %19 = vector.broadcast %cst_13 : f32 to vector<8x64xf32>
    %c0_14 = arith.constant 0 : index
    %c0_15 = arith.constant 0 : index
    %20 = vector.load %arg7[%c0_14, %c0_15] : memref<1x64xf32, #tpu.memory_space<vmem>>, vector<1x64xf32>
    %21 = vector.broadcast %20 : vector<1x64xf32> to vector<8x64xf32>
    %22 = arith.addf %19, %21 : vector<8x64xf32>
    %23 = vector.extract_strided_slice %18 {offsets = [0, 0], sizes = [8, 8], strides = [1, 1]} : vector<120x8xf32> to vector<8x8xf32>
    %c0_16 = arith.constant 0 : index
    %c0_17 = arith.constant 0 : index
    %24 = vector.load %arg6[%c0_16, %c0_17] : memref<120x64xf32, #tpu.memory_space<vmem>>, vector<8x64xf32>
    %cst_18 = arith.constant dense<0.000000e+00> : vector<8x64xf32>
    %25 = tpu.matmul %23, %24, %cst_18 {dimension_numbers = #tpu.dot_dimension_numbers<[1], [0], [0], [1], [0, 0, 1, 1], [], []>} : vector<8x8xf32>, vector<8x64xf32>, vector<8x64xf32> -> vector<8x64xf32>
    %26 = arith.addf %22, %25 : vector<8x64xf32>
    %27 = vector.extract_strided_slice %18 {offsets = [8, 0], sizes = [8, 8], strides = [1, 1]} : vector<120x8xf32> to vector<8x8xf32>
    %c8 = arith.constant 8 : index
    %c0_19 = arith.constant 0 : index
    %28 = vector.load %arg6[%c8, %c0_19] : memref<120x64xf32, #tpu.memory_space<vmem>>, vector<8x64xf32>
    %cst_20 = arith.constant dense<0.000000e+00> : vector<8x64xf32>
    %29 = tpu.matmul %27, %28, %cst_20 {dimension_numbers = #tpu.dot_dimension_numbers<[1], [0], [0], [1], [0, 0, 1, 1], [], []>} : vector<8x8xf32>, vector<8x64xf32>, vector<8x64xf32> -> vector<8x64xf32>
    %30 = arith.addf %26, %29 : vector<8x64xf32>
    %31 = vector.extract_strided_slice %18 {offsets = [16, 0], sizes = [8, 8], strides = [1, 1]} : vector<120x8xf32> to vector<8x8xf32>
    %c16 = arith.constant 16 : index
    %c0_21 = arith.constant 0 : index
    %32 = vector.load %arg6[%c16, %c0_21] : memref<120x64xf32, #tpu.memory_space<vmem>>, vector<8x64xf32>
    %cst_22 = arith.constant dense<0.000000e+00> : vector<8x64xf32>
    %33 = tpu.matmul %31, %32, %cst_22 {dimension_numbers = #tpu.dot_dimension_numbers<[1], [0], [0], [1], [0, 0, 1, 1], [], []>} : vector<8x8xf32>, vector<8x64xf32>, vector<8x64xf32> -> vector<8x64xf32>
    %34 = arith.addf %30, %33 : vector<8x64xf32>
    %35 = vector.extract_strided_slice %18 {offsets = [24, 0], sizes = [8, 8], strides = [1, 1]} : vector<120x8xf32> to vector<8x8xf32>
    %c24 = arith.constant 24 : index
    %c0_23 = arith.constant 0 : index
    %36 = vector.load %arg6[%c24, %c0_23] : memref<120x64xf32, #tpu.memory_space<vmem>>, vector<8x64xf32>
    %cst_24 = arith.constant dense<0.000000e+00> : vector<8x64xf32>
    %37 = tpu.matmul %35, %36, %cst_24 {dimension_numbers = #tpu.dot_dimension_numbers<[1], [0], [0], [1], [0, 0, 1, 1], [], []>} : vector<8x8xf32>, vector<8x64xf32>, vector<8x64xf32> -> vector<8x64xf32>
    %38 = arith.addf %34, %37 : vector<8x64xf32>
    %39 = vector.extract_strided_slice %18 {offsets = [32, 0], sizes = [8, 8], strides = [1, 1]} : vector<120x8xf32> to vector<8x8xf32>
    %c32 = arith.constant 32 : index
    %c0_25 = arith.constant 0 : index
    %40 = vector.load %arg6[%c32, %c0_25] : memref<120x64xf32, #tpu.memory_space<vmem>>, vector<8x64xf32>
    %cst_26 = arith.constant dense<0.000000e+00> : vector<8x64xf32>
    %41 = tpu.matmul %39, %40, %cst_26 {dimension_numbers = #tpu.dot_dimension_numbers<[1], [0], [0], [1], [0, 0, 1, 1], [], []>} : vector<8x8xf32>, vector<8x64xf32>, vector<8x64xf32> -> vector<8x64xf32>
    %42 = arith.addf %38, %41 : vector<8x64xf32>
    %43 = vector.extract_strided_slice %18 {offsets = [40, 0], sizes = [8, 8], strides = [1, 1]} : vector<120x8xf32> to vector<8x8xf32>
    %c40 = arith.constant 40 : index
    %c0_27 = arith.constant 0 : index
    %44 = vector.load %arg6[%c40, %c0_27] : memref<120x64xf32, #tpu.memory_space<vmem>>, vector<8x64xf32>
    %cst_28 = arith.constant dense<0.000000e+00> : vector<8x64xf32>
    %45 = tpu.matmul %43, %44, %cst_28 {dimension_numbers = #tpu.dot_dimension_numbers<[1], [0], [0], [1], [0, 0, 1, 1], [], []>} : vector<8x8xf32>, vector<8x64xf32>, vector<8x64xf32> -> vector<8x64xf32>
    %46 = arith.addf %42, %45 : vector<8x64xf32>
    %47 = vector.extract_strided_slice %18 {offsets = [48, 0], sizes = [8, 8], strides = [1, 1]} : vector<120x8xf32> to vector<8x8xf32>
    %c48 = arith.constant 48 : index
    %c0_29 = arith.constant 0 : index
    %48 = vector.load %arg6[%c48, %c0_29] : memref<120x64xf32, #tpu.memory_space<vmem>>, vector<8x64xf32>
    %cst_30 = arith.constant dense<0.000000e+00> : vector<8x64xf32>
    %49 = tpu.matmul %47, %48, %cst_30 {dimension_numbers = #tpu.dot_dimension_numbers<[1], [0], [0], [1], [0, 0, 1, 1], [], []>} : vector<8x8xf32>, vector<8x64xf32>, vector<8x64xf32> -> vector<8x64xf32>
    %50 = arith.addf %46, %49 : vector<8x64xf32>
    %51 = vector.extract_strided_slice %18 {offsets = [56, 0], sizes = [8, 8], strides = [1, 1]} : vector<120x8xf32> to vector<8x8xf32>
    %c56 = arith.constant 56 : index
    %c0_31 = arith.constant 0 : index
    %52 = vector.load %arg6[%c56, %c0_31] : memref<120x64xf32, #tpu.memory_space<vmem>>, vector<8x64xf32>
    %cst_32 = arith.constant dense<0.000000e+00> : vector<8x64xf32>
    %53 = tpu.matmul %51, %52, %cst_32 {dimension_numbers = #tpu.dot_dimension_numbers<[1], [0], [0], [1], [0, 0, 1, 1], [], []>} : vector<8x8xf32>, vector<8x64xf32>, vector<8x64xf32> -> vector<8x64xf32>
    %54 = arith.addf %50, %53 : vector<8x64xf32>
    %55 = vector.extract_strided_slice %18 {offsets = [64, 0], sizes = [8, 8], strides = [1, 1]} : vector<120x8xf32> to vector<8x8xf32>
    %c64 = arith.constant 64 : index
    %c0_33 = arith.constant 0 : index
    %56 = vector.load %arg6[%c64, %c0_33] : memref<120x64xf32, #tpu.memory_space<vmem>>, vector<8x64xf32>
    %cst_34 = arith.constant dense<0.000000e+00> : vector<8x64xf32>
    %57 = tpu.matmul %55, %56, %cst_34 {dimension_numbers = #tpu.dot_dimension_numbers<[1], [0], [0], [1], [0, 0, 1, 1], [], []>} : vector<8x8xf32>, vector<8x64xf32>, vector<8x64xf32> -> vector<8x64xf32>
    %58 = arith.addf %54, %57 : vector<8x64xf32>
    %59 = vector.extract_strided_slice %18 {offsets = [72, 0], sizes = [8, 8], strides = [1, 1]} : vector<120x8xf32> to vector<8x8xf32>
    %c72 = arith.constant 72 : index
    %c0_35 = arith.constant 0 : index
    %60 = vector.load %arg6[%c72, %c0_35] : memref<120x64xf32, #tpu.memory_space<vmem>>, vector<8x64xf32>
    %cst_36 = arith.constant dense<0.000000e+00> : vector<8x64xf32>
    %61 = tpu.matmul %59, %60, %cst_36 {dimension_numbers = #tpu.dot_dimension_numbers<[1], [0], [0], [1], [0, 0, 1, 1], [], []>} : vector<8x8xf32>, vector<8x64xf32>, vector<8x64xf32> -> vector<8x64xf32>
    %62 = arith.addf %58, %61 : vector<8x64xf32>
    %63 = vector.extract_strided_slice %18 {offsets = [80, 0], sizes = [8, 8], strides = [1, 1]} : vector<120x8xf32> to vector<8x8xf32>
    %c80 = arith.constant 80 : index
    %c0_37 = arith.constant 0 : index
    %64 = vector.load %arg6[%c80, %c0_37] : memref<120x64xf32, #tpu.memory_space<vmem>>, vector<8x64xf32>
    %cst_38 = arith.constant dense<0.000000e+00> : vector<8x64xf32>
    %65 = tpu.matmul %63, %64, %cst_38 {dimension_numbers = #tpu.dot_dimension_numbers<[1], [0], [0], [1], [0, 0, 1, 1], [], []>} : vector<8x8xf32>, vector<8x64xf32>, vector<8x64xf32> -> vector<8x64xf32>
    %66 = arith.addf %62, %65 : vector<8x64xf32>
    %67 = vector.extract_strided_slice %18 {offsets = [88, 0], sizes = [8, 8], strides = [1, 1]} : vector<120x8xf32> to vector<8x8xf32>
    %c88 = arith.constant 88 : index
    %c0_39 = arith.constant 0 : index
    %68 = vector.load %arg6[%c88, %c0_39] : memref<120x64xf32, #tpu.memory_space<vmem>>, vector<8x64xf32>
    %cst_40 = arith.constant dense<0.000000e+00> : vector<8x64xf32>
    %69 = tpu.matmul %67, %68, %cst_40 {dimension_numbers = #tpu.dot_dimension_numbers<[1], [0], [0], [1], [0, 0, 1, 1], [], []>} : vector<8x8xf32>, vector<8x64xf32>, vector<8x64xf32> -> vector<8x64xf32>
    %70 = arith.addf %66, %69 : vector<8x64xf32>
    %71 = vector.extract_strided_slice %18 {offsets = [96, 0], sizes = [8, 8], strides = [1, 1]} : vector<120x8xf32> to vector<8x8xf32>
    %c96 = arith.constant 96 : index
    %c0_41 = arith.constant 0 : index
    %72 = vector.load %arg6[%c96, %c0_41] : memref<120x64xf32, #tpu.memory_space<vmem>>, vector<8x64xf32>
    %cst_42 = arith.constant dense<0.000000e+00> : vector<8x64xf32>
    %73 = tpu.matmul %71, %72, %cst_42 {dimension_numbers = #tpu.dot_dimension_numbers<[1], [0], [0], [1], [0, 0, 1, 1], [], []>} : vector<8x8xf32>, vector<8x64xf32>, vector<8x64xf32> -> vector<8x64xf32>
    %74 = arith.addf %70, %73 : vector<8x64xf32>
    %75 = vector.extract_strided_slice %18 {offsets = [104, 0], sizes = [8, 8], strides = [1, 1]} : vector<120x8xf32> to vector<8x8xf32>
    %c104 = arith.constant 104 : index
    %c0_43 = arith.constant 0 : index
    %76 = vector.load %arg6[%c104, %c0_43] : memref<120x64xf32, #tpu.memory_space<vmem>>, vector<8x64xf32>
    %cst_44 = arith.constant dense<0.000000e+00> : vector<8x64xf32>
    %77 = tpu.matmul %75, %76, %cst_44 {dimension_numbers = #tpu.dot_dimension_numbers<[1], [0], [0], [1], [0, 0, 1, 1], [], []>} : vector<8x8xf32>, vector<8x64xf32>, vector<8x64xf32> -> vector<8x64xf32>
    %78 = arith.addf %74, %77 : vector<8x64xf32>
    %79 = vector.extract_strided_slice %18 {offsets = [112, 0], sizes = [8, 8], strides = [1, 1]} : vector<120x8xf32> to vector<8x8xf32>
    %c112 = arith.constant 112 : index
    %c0_45 = arith.constant 0 : index
    %80 = vector.load %arg6[%c112, %c0_45] : memref<120x64xf32, #tpu.memory_space<vmem>>, vector<8x64xf32>
    %cst_46 = arith.constant dense<0.000000e+00> : vector<8x64xf32>
    %81 = tpu.matmul %79, %80, %cst_46 {dimension_numbers = #tpu.dot_dimension_numbers<[1], [0], [0], [1], [0, 0, 1, 1], [], []>} : vector<8x8xf32>, vector<8x64xf32>, vector<8x64xf32> -> vector<8x64xf32>
    %82 = arith.addf %78, %81 : vector<8x64xf32>
    %c0_47 = arith.constant 0 : index
    %c0_48 = arith.constant 0 : index
    %83 = vector.load %arg8[%c0_47, %c0_48] : memref<8x64xf32, #tpu.memory_space<vmem>>, vector<8x64xf32>
    tpu.vector_store %arg8[%c0_47, %c0_48], %82 {strides = array<i32>} : memref<8x64xf32, #tpu.memory_space<vmem>>, vector<8x64xf32>,
    return
  }
  func.func @transform_0(%arg0: i32) -> (i32, i32, i32) {
    %c0_i32 = arith.constant 0 : i32
    %c0_i32_0 = arith.constant 0 : i32
    %c0_i32_1 = arith.constant 0 : i32
    return %c0_i32, %arg0, %c0_i32_0 : i32, i32, i32
  }
  func.func @transform_1(%arg0: i32) -> (i32, i32) {
    %c0_i32 = arith.constant 0 : i32
    %c0_i32_0 = arith.constant 0 : i32
    %c0_i32_1 = arith.constant 0 : i32
    return %c0_i32, %c0_i32_0 : i32, i32
  }
  func.func @transform_2(%arg0: i32) -> (i32, i32) {
    %c0_i32 = arith.constant 0 : i32
    %c0_i32_0 = arith.constant 0 : i32
    %c0_i32_1 = arith.constant 0 : i32
    return %c0_i32, %c0_i32_0 : i32, i32
  }
  func.func @transform_3(%arg0: i32) -> (i32, i32) {
    %c0_i32 = arith.constant 0 : i32
    %c0_i32_0 = arith.constant 0 : i32
    %c0_i32_1 = arith.constant 0 : i32
    return %c0_i32, %c0_i32_0 : i32, i32
  }
  func.func @transform_4(%arg0: i32) -> (i32, i32) {
    %c0_i32 = arith.constant 0 : i32
    %c0_i32_0 = arith.constant 0 : i32
    %c0_i32_1 = arith.constant 0 : i32
    return %c0_i32, %c0_i32_0 : i32, i32
  }
  func.func @transform_5(%arg0: i32) -> (i32, i32) {
    %c0_i32 = arith.constant 0 : i32
    %c0_i32_0 = arith.constant 0 : i32
    %c0_i32_1 = arith.constant 0 : i32
    return %c0_i32, %c0_i32_0 : i32, i32
  }
  func.func @transform_6(%arg0: i32) -> (i32, i32) {
    %c0_i32 = arith.constant 0 : i32
    %c0_i32_0 = arith.constant 0 : i32
    %c0_i32_1 = arith.constant 0 : i32
    return %c0_i32, %c0_i32_0 : i32, i32
  }
  func.func @transform_7(%arg0: i32) -> (i32, i32) {
    %c0_i32 = arith.constant 0 : i32
    %c0_i32_0 = arith.constant 0 : i32
    return %arg0, %c0_i32 : i32, i32
  }
}

</mosaic_0001>

<bundles_post_ra>
// kernel: cnn_forward.1
= control target key start
LH: loop header
LB: loop body
LE: loop exit
PB: predicated region body
PF: predicated region fallthrough
CT: control target
= control target key end

     0   :  { %vm68_vm0 = vcmask 326656   ;;  %v2129_v3 = vmov 0.0   ;;  %vm2130_vm1 = vmmov 0   ;;  %vm427_vm2 = vcmask 64512   ;;  %s2540_s1 = inlined_call_operand.vmem [shape: f32[40,8], index: 1, kind: input, shape index: {}]   ;;  %s2541_s0 = inlined_call_operand.vmem [shape: f32[30,8,40], index: 0, kind: input, shape index: {}]   ;;  %s2542_s3 = inlined_call_operand.vmem [shape: f32[8,8], index: 3, kind: input, shape index: {}]   ;;  %s2543_s2 = inlined_call_operand.vmem [shape: f32[1,8], index: 2, kind: input, shape index: {}]   ;;  %s2544_s5 = inlined_call_operand.vmem [shape: f32[120,64], index: 5, kind: input, shape index: {}]   ;;  %s2545_s4 = inlined_call_operand.vmem [shape: f32[1,8], index: 4, kind: input, shape index: {}]   ;;  %s2546_s6 = inlined_call_operand.vmem [shape: f32[1,64], index: 6, kind: input, shape index: {}]   ;;  %s2547_s7 = inlined_call_operand.vmem [shape: f32[8,64], index: 7, kind: output, shape index: {}]  }
   0x1   :  { %v56_v0 = vld [vmem:[%s2540_s1] sm:$0xff]  ;;  %v57_v1 = vld [vmem:[%s2540_s1 + $0x8] sm:$0xff]  ;;  %v58_v2 = vld [vmem:[%s2540_s1 + $0x10] sm:$0xff]  ;;  %2096 = vmatprep.subr.mxu1 %v2129_v3  ;;  %1986 = vmatprep.mubr.msk.f32.mxu1 %vm2130_vm1, %v2129_v3  ;;  %vm1761_vm3 = vcmask 523264  }
   0x2   :  { %v2088_v4 = vpack.c.bf16 %v57_v1, %v56_v0  ;;  %v59_v5 = vld [vmem:[%s2540_s1 + $0x18] sm:$0xff]  ;;  %v26_v6 = vld [vmem:[%s2541_s0] sm:$0xff]  ;;  %v27_v9 = vld [vmem:[%s2541_s0 + $0x8] sm:$0xff] }
   0x3   :  { %v2092_v7 = vpack.c.bf16 %v59_v5, %v58_v2  ;;  %1921 = vmatprep.mubr.msk.f32.mxu0 %vm68_vm0, %v26_v6  ;;  %v60_v8 = vld [vmem:[%s2540_s1 + $0x20] sm:$0xff]  ;;  %v28_v10 = vld [vmem:[%s2541_s0 + $0x10] sm:$0xff]  ;;  %v29_v12 = vld [vmem:[%s2541_s0 + $0x18] sm:$0xff] }
   0x4   :  { %2089 = vmatprep.subr.bf16.mxu0 %v2088_v4  ;;  %v419_v11 = vld [vmem:[%s2542_s3] sm:$0xff]  ;;  %v31_v14 = vld [vmem:[%s2541_s0 + $0x28] sm:$0xff]  ;;  %v32_v15 = vld [vmem:[%s2541_s0 + $0x30] sm:$0xff] }
   0x5   :  { %2091 = vmatpush3.bf16.msra.mxu0 %v2088_v4  ;;  %2097 = vmatpush3.msra.mxu1 %v419_v11  ;;  %v30_v13 = vld [vmem:[%s2541_s0 + $0x20] sm:$0xff]  ;;  %v33_v16 = vld [vmem:[%s2541_s0 + $0x38] sm:$0xff]  ;;  %v35_v18 = vld [vmem:[%s2541_s0 + $0x48] sm:$0xff] }
   0x6   :  { %2093 = vmatprep.subr.bf16.mxu0 %v2092_v7  ;;  %2013 = vmatprep.subr.mxu1 %v2129_v3  ;;  %v34_v17 = vld [vmem:[%s2541_s0 + $0x40] sm:$0xff]  ;;  %v36_v19 = vld [vmem:[%s2541_s0 + $0x50] sm:$0xff]  ;;  %v37_v20 = vld [vmem:[%s2541_s0 + $0x58] sm:$0xff] }
   0x7   :  { %v38_v21 = vld [vmem:[%s2541_s0 + $0x60] sm:$0xff]  ;;  %v39_v22 = vld [vmem:[%s2541_s0 + $0x68] sm:$0xff]  ;;  %v40_v23 = vld [vmem:[%s2541_s0 + $0x70] sm:$0xff] }
   0x8   :  { %v41_v24 = vld [vmem:[%s2541_s0 + $0x78] sm:$0xff]  ;;  %v42_v25 = vld [vmem:[%s2541_s0 + $0x80] sm:$0xff]  ;;  %v43_v26 = vld [vmem:[%s2541_s0 + $0x88] sm:$0xff] }
   0x9   :  { %2095 = vmatpush3.bf16.msra.mxu0 %v2092_v7  ;;  %v44_v27 = vld [vmem:[%s2541_s0 + $0x90] sm:$0xff]  ;;  %v45_v28 = vld [vmem:[%s2541_s0 + $0x98] sm:$0xff]  ;;  %v46_v29 = vld [vmem:[%s2541_s0 + $0xa0] sm:$0xff] }
   0xa   :  { %1919 = vmatprep.subr.mxu0 %v60_v8  ;;  %v47_v30 = vld [vmem:[%s2541_s0 + $0xa8] sm:$0xff]  ;;  %v48_v31 = vld [vmem:[%s2541_s0 + $0xb0] sm:$0xff]  ;;  %v49_v32 = vld [vmem:[%s2541_s0 + $0xb8] sm:$0xff] }
   0xb   :  { %v50_v33 = vld [vmem:[%s2541_s0 + $0xc0] sm:$0xff]  ;;  %v51_v34 = vld [vmem:[%s2541_s0 + $0xc8] sm:$0xff]  ;;  %v52_v35 = vld [vmem:[%s2541_s0 + $0xd0] sm:$0xff] }
   0xc   :  { %v53_v36 = vld [vmem:[%s2541_s0 + $0xd8] sm:$0xff]  ;;  %v54_v37 = vld [vmem:[%s2541_s0 + $0xe0] sm:$0xff]  ;;  %v55_v38 = vld [vmem:[%s2541_s0 + $0xe8] sm:$0xff] }
   0xd   :  { %1920 = vmatpush3.msra.mxu0 %v60_v8  ;;  %v2325_v51 = vld [vmem:[%s2543_s2] ss:$0 sm:$0xff] }
   0xe   :  { %1922 = vmatmul.mubr.msk.f32.vlgmr.msra.gmra.mrb[0].mxu0 %vm68_vm0, %v27_v9  ;;  %1966 = vmatprep.subr.mxu0 %v2129_v3 }
   0xf   :  { %1924 = vmatprep.mubr.msk.f32.mxu0 %vm68_vm0, %v28_v10  ;;  %1967 = vmatpush3.msra.mxu0 %v419_v11 }
  0x12   :  { %1925 = vmatmul.mubr.msk.f32.gmra.mrb[2].mxu0 %vm68_vm0, %v29_v12 }
  0x13   :  { %1927 = vmatprep.mubr.msk.f32.mxu0 %vm68_vm0, %v30_v13 }
  0x16   :  { %1928 = vmatmul.mubr.msk.f32.gmra.mrb[4].mxu0 %vm68_vm0, %v31_v14 }
  0x17   :  { %1930 = vmatprep.mubr.msk.f32.mxu0 %vm68_vm0, %v32_v15 }
  0x1a   :  { %1931 = vmatmul.mubr.msk.f32.gmra.mrb[6].mxu0 %vm68_vm0, %v33_v16 }
  0x1b   :  { %1933 = vmatprep.mubr.msk.f32.mxu0 %vm68_vm0, %v34_v17 }
  0x1e   :  { %1934 = vmatmul.mubr.msk.f32.gmra.mrb[8].mxu0 %vm68_vm0, %v35_v18 }
  0x1f   :  { %1936 = vmatprep.mubr.msk.f32.mxu0 %vm68_vm0, %v36_v19 }
  0x22   :  { %1937 = vmatmul.mubr.msk.f32.gmra.mrb[10].mxu0 %vm68_vm0, %v37_v20 }
  0x23   :  { %1939 = vmatprep.mubr.msk.f32.mxu0 %vm68_vm0, %v38_v21 }
  0x26   :  { %1940 = vmatmul.mubr.msk.f32.gmra.mrb[12].mxu0 %vm68_vm0, %v39_v22 }
  0x27   :  { %1942 = vmatprep.mubr.msk.f32.mxu0 %vm68_vm0, %v40_v23 }
  0x2a   :  { %1943 = vmatmul.mubr.msk.f32.gmra.mrb[14].mxu0 %vm68_vm0, %v41_v24 }
  0x2b   :  { %1945 = vmatprep.mubr.msk.f32.mxu0 %vm68_vm0, %v42_v25 }
  0x2e   :  { %1946 = vmatmul.mubr.msk.f32.gmra.mrb[16].mxu0 %vm68_vm0, %v43_v26 }
  0x2f   :  { %1948 = vmatprep.mubr.msk.f32.mxu0 %vm68_vm0, %v44_v27 }
  0x32   :  { %1949 = vmatmul.mubr.msk.f32.gmra.mrb[18].mxu0 %vm68_vm0, %v45_v28 }
  0x33   :  { %1951 = vmatprep.mubr.msk.f32.mxu0 %vm68_vm0, %v46_v29 }
  0x36   :  { %1952 = vmatmul.mubr.msk.f32.gmra.mrb[20].mxu0 %vm68_vm0, %v47_v30 }
  0x37   :  { %1954 = vmatprep.mubr.msk.f32.mxu0 %vm68_vm0, %v48_v31 }
  0x3a   :  { %1955 = vmatmul.mubr.msk.f32.gmra.mrb[22].mxu0 %vm68_vm0, %v49_v32 }
  0x3b   :  { %1957 = vmatprep.mubr.msk.f32.mxu0 %vm68_vm0, %v50_v33 }
  0x3e   :  { %1958 = vmatmul.mubr.msk.f32.gmra.mrb[24].mxu0 %vm68_vm0, %v51_v34 }
  0x3f   :  { %1960 = vmatprep.mubr.msk.f32.mxu0 %vm68_vm0, %v52_v35 }
  0x42   :  { %1961 = vmatmul.mubr.msk.f32.gmra.mrb[26].mxu0 %vm68_vm0, %v53_v36 }
  0x43   :  { %1963 = vmatprep.mubr.msk.f32.mxu0 %vm68_vm0, %v54_v37 }
  0x46   :  { %1964 = vmatmul.mubr.msk.f32.gmra.mrb[28].mxu0 %vm68_vm0, %v55_v38 }
  0x47   :  { %1968 = vmatprep.mubr.msk.f32.mxu0 %vm2130_vm1, %v2129_v3 }
  0xe1   :  { %v1923_v39 = vpop.f32.mrb[0].mxu0 }
  0xe2   :  { %v225_v40 = vpop.f32.mrb[1].mxu0  ;;  %v231_v61 = vadd.f32 %v1923_v39, %v2325_v51 }
  0xe3   :  { %v226_v54 = vadd.f32 %v2325_v51, %v225_v40  ;;  %v636_v40 = vld [vmem:[%s2544_s5] sm:$0xff] }
  0xe4   :  { %v375_v7 = vmax.f32 %v231_v61, 0.0 }
  0xe5   :  { %v1926_v41 = vpop.f32.mrb[2].mxu0  ;;  %v374_v58 = vmax.f32 %v226_v54, 0.0 }
  0xe6   :  { %v235_v42 = vpop.f32.mrb[3].mxu0  ;;  %v241_v8 = vadd.f32 %v1926_v41, %v2325_v51 }
  0xe7   :  { %v236_v59 = vadd.f32 %v2325_v51, %v235_v42 }
  0xe8   :  { %v377_v19 = vmax.f32 %v241_v8, 0.0 }
  0xe9   :  { %v1929_v43 = vpop.f32.mrb[4].mxu0  ;;  %v376_v4 = vmax.f32 %v236_v59, 0.0 }
  0xea   :  { %v245_v44 = vpop.f32.mrb[5].mxu0  ;;  %v251_v20 = vadd.f32 %v1929_v43, %v2325_v51 }
  0xeb   :  { %v246_v5 = vadd.f32 %v2325_v51, %v245_v44 }
  0xec   :  { %v379_v31 = vmax.f32 %v251_v20, 0.0 }
  0xed   :  { %v1932_v45 = vpop.f32.mrb[6].mxu0  ;;  %v378_v16 = vmax.f32 %v246_v5, 0.0 }
  0xee   :  { %v255_v46 = vpop.f32.mrb[7].mxu0  ;;  %v261_v32 = vadd.f32 %v1932_v45, %v2325_v51 }
  0xef   :  { %v256_v17 = vadd.f32 %v2325_v51, %v255_v46 }
  0xf0   :  { %v381_v44 = vmax.f32 %v261_v32, 0.0  ;;  %v786_v32 = vld [vmem:[%s2544_s5 + $0x10] sm:$0xff] }
  0xf1   :  { %v2316_v47 = vpop.f32.mrb[8].mxu0  ;;  %v380_v28 = vmax.f32 %v256_v17, 0.0 }
  0xf2   :  { %v265_v48 = vpop.f32.mrb[9].mxu0  ;;  %v271_v45 = vadd.f32 %v2316_v47, %v2325_v51 }
  0xf3   :  { %v266_v29 = vadd.f32 %v2325_v51, %v265_v48 }
  0xf4   :  { %v383_v61 = vmax.f32 %v271_v45, 0.0 }
  0xf5   :  { %v2318_v49 = vpop.f32.mrb[10].mxu0  ;;  %v382_v41 = vmax.f32 %v266_v29, 0.0 }
  0xf6   :  { %v2320_v50 = vpop.f32.mrb[11].mxu0 }
  0xf7   :  { %v276_v42 = vadd.f32 %v2325_v51, %v2320_v50 }
  0xf9   :  { %v2327_v52 = vpop.f32.mrb[12].mxu0  ;;  %v384_v47 = vmax.f32 %v276_v42, 0.0 }
  0xfa   :  { %v2329_v53 = vpop.f32.mrb[13].mxu0 }
  0xfb   :  { %v286_v59 = vadd.f32 %v2325_v51, %v2329_v53 }
  0xfd   :  { %v1944_v55 = vpop.f32.mrb[14].mxu0 }
  0xfe   :  { %v301_v56 = vadd.f32 %v1944_v55, %v2325_v51  ;;  %v2333_v57 = vpop.f32.mrb[15].mxu0 }
 0x100   :  { %v389_v60 = vmax.f32 %v301_v56, 0.0 }
 0x101   :  { %v1947_v62 = vpop.f32.mrb[16].mxu0 }
 0x102   :  { %v404_v63 = vmax.f32 %v374_v58, %v389_v60  ;;  %v311_v0 = vadd.f32 %v1947_v62, %v2325_v51  ;;  %v305_v1 = vpop.f32.mrb[17].mxu0  ;;  %v281_v62 = vadd.f32 %v2318_v49, %v2325_v51  ;;  %v386_v49 = vmax.f32 %v286_v59, 0.0  ;;  %v936_v59 = vld [vmem:[%s2544_s5 + $0x20] sm:$0xff] }
 0x103   :  { %v306_v2 = vadd.f32 %v2325_v51, %v305_v1 }
 0x104   :  { %v391_v6 = vmax.f32 %v311_v0, 0.0  ;;  %1969 = vmatmul.mubr.msk.f32.vlgmr.msra.gmra.mrb[30].mxu0 %vm427_vm2, %v404_v63  ;;  %v385_v8 = vmax.f32 %v281_v62, 0.0 }
 0x105   :  { %v390_v9 = vmax.f32 %v306_v2, 0.0  ;;  %v1950_v10 = vpop.f32.mrb[18].mxu0  ;;  %1971 = vmatprep.mubr.msk.f32.mxu0 %vm2130_vm1, %v2129_v3 }
 0x106   :  { %v406_v11 = vmax.f32 %v376_v4, %v391_v6  ;;  %v321_v12 = vadd.f32 %v1950_v10, %v2325_v51  ;;  %v315_v13 = vpop.f32.mrb[19].mxu0  ;;  %v296_v6 = vadd.f32 %v2325_v51, %v2333_v57 }
 0x107   :  { %v405_v14 = vmax.f32 %v375_v7, %v390_v9  ;;  %v316_v15 = vadd.f32 %v2325_v51, %v315_v13  ;;  %v291_v9 = vadd.f32 %v2327_v52, %v2325_v51 }
 0x108   :  { %v393_v18 = vmax.f32 %v321_v12, 0.0 }
 0x109   :  { %v392_v21 = vmax.f32 %v316_v15, 0.0  ;;  %v1953_v22 = vpop.f32.mrb[20].mxu0  ;;  %1972 = vmatmul.mubr.msk.f32.gmra.mrb[32].mxu0 %vm427_vm2, %v405_v14 }
 0x10a   :  { %v408_v23 = vmax.f32 %v378_v16, %v393_v18  ;;  %v331_v24 = vadd.f32 %v1953_v22, %v2325_v51  ;;  %v325_v25 = vpop.f32.mrb[21].mxu0  ;;  %1974 = vmatprep.mubr.msk.f32.mxu0 %vm2130_vm1, %v2129_v3  ;;  %v388_v16 = vmax.f32 %v296_v6, 0.0  ;;  %v387_v18 = vmax.f32 %v291_v9, 0.0 }
 0x10b   :  { %v407_v26 = vmax.f32 %v377_v19, %v392_v21  ;;  %v326_v27 = vadd.f32 %v2325_v51, %v325_v25  ;;  %v711_v25 = vld [vmem:[%s2544_s5 + $0x8] sm:$0xff] }
 0x10c   :  { %v395_v30 = vmax.f32 %v331_v24, 0.0 }
 0x10d   :  { %v394_v33 = vmax.f32 %v326_v27, 0.0  ;;  %v1956_v34 = vpop.f32.mrb[22].mxu0  ;;  %1975 = vmatmul.mubr.msk.f32.gmra.mrb[34].mxu0 %vm427_vm2, %v406_v11 }
 0x10e   :  { %v410_v35 = vmax.f32 %v380_v28, %v395_v30  ;;  %v341_v36 = vadd.f32 %v1956_v34, %v2325_v51  ;;  %v335_v37 = vpop.f32.mrb[23].mxu0  ;;  %1977 = vmatprep.mubr.msk.f32.mxu0 %vm2130_vm1, %v2129_v3 }
 0x10f   :  { %v409_v38 = vmax.f32 %v379_v31, %v394_v33  ;;  %v336_v39 = vadd.f32 %v2325_v51, %v335_v37 }
 0x110   :  { %v397_v43 = vmax.f32 %v341_v36, 0.0  ;;  %1987 = vmatmul.mubr.msk.f32.vlgmr.msra.gmra.mrb[0].mxu1 %vm427_vm2, %v410_v35 }
 0x111   :  { %v396_v46 = vmax.f32 %v336_v39, 0.0  ;;  %v1959_v48 = vpop.f32.mrb[24].mxu0  ;;  %1978 = vmatmul.mubr.msk.f32.gmra.mrb[36].mxu0 %vm427_vm2, %v407_v26  ;;  %1989 = vmatprep.mubr.msk.f32.mxu1 %vm2130_vm1, %v2129_v3 }
 0x112   :  { %v412_v54 = vmax.f32 %v382_v41, %v397_v43  ;;  %v351_v55 = vadd.f32 %v1959_v48, %v2325_v51  ;;  %v345_v56 = vpop.f32.mrb[25].mxu0  ;;  %1980 = vmatprep.mubr.msk.f32.mxu0 %vm2130_vm1, %v2129_v3  ;;  %2014 = vmatpush3.msra.mxu1 %v636_v40  ;;  %v861_v43 = vld [vmem:[%s2544_s5 + $0x18] sm:$0xff] }
 0x113   :  { %v411_v50 = vmax.f32 %v381_v44, %v396_v46  ;;  %v346_v58 = vadd.f32 %v2325_v51, %v345_v56  ;;  %2018 = vmatprep.subr.mxu1 %v2129_v3 }
 0x114   :  { %v399_v60 = vmax.f32 %v351_v55, 0.0 }
 0x115   :  { %v398_v63 = vmax.f32 %v346_v58, 0.0  ;;  %v1962_v0 = vpop.f32.mrb[26].mxu0  ;;  %1981 = vmatmul.mubr.msk.f32.gmra.mrb[38].mxu0 %vm427_vm2, %v408_v23  ;;  %1990 = vmatmul.mubr.msk.f32.gmra.mrb[2].mxu1 %vm427_vm2, %v411_v50 }
 0x116   :  { %v414_v1 = vmax.f32 %v384_v47, %v399_v60  ;;  %v361_v2 = vadd.f32 %v1962_v0, %v2325_v51  ;;  %v355_v4 = vpop.f32.mrb[27].mxu0  ;;  %1983 = vmatprep.mubr.msk.f32.mxu0 %vm2130_vm1, %v2129_v3  ;;  %1992 = vmatprep.mubr.msk.f32.mxu1 %vm2130_vm1, %v2129_v3 }
 0x117   :  { %v413_v53 = vmax.f32 %v383_v61, %v398_v63  ;;  %v356_v5 = vadd.f32 %v2325_v51, %v355_v4 }
 0x118   :  { %v401_v7 = vmax.f32 %v361_v2, 0.0 }
 0x119   :  { %v400_v10 = vmax.f32 %v356_v5, 0.0  ;;  %v1965_v11 = vpop.f32.mrb[28].mxu0  ;;  %1984 = vmatmul.mubr.msk.f32.gmra.mrb[40].mxu0 %vm427_vm2, %v409_v38  ;;  %1993 = vmatmul.mubr.msk.f32.gmra.mrb[4].mxu1 %vm427_vm2, %v412_v54 }
 0x11a   :  { %v416_v12 = vmax.f32 %v386_v49, %v401_v7  ;;  %v371_v13 = vadd.f32 %v1965_v11, %v2325_v51  ;;  %v365_v14 = vpop.f32.mrb[29].mxu0  ;;  %1995 = vmatprep.mubr.msk.f32.mxu1 %vm2130_vm1, %v2129_v3 }
 0x11b   :  { %v415_v15 = vmax.f32 %v385_v8, %v400_v10  ;;  %v366_v57 = vadd.f32 %v2325_v51, %v365_v14  ;;  %v2419_v51 = vld [vmem:[%s2545_s4] ss:$0 sm:$0xff] }
 0x11c   :  { %v403_v17 = vmax.f32 %v371_v13, 0.0 }
 0x11d   :  { %v402_v52 = vmax.f32 %v366_v57, 0.0  ;;  %1996 = vmatmul.mubr.msk.f32.gmra.mrb[6].mxu1 %vm427_vm2, %v413_v53  ;;  %v1011_v53 = vld [vmem:[%s2544_s5 + $0x28] sm:$0xff] }
 0x11e   :  { %v418_v19 = vmax.f32 %v388_v16, %v403_v17  ;;  %1998 = vmatprep.mubr.msk.f32.mxu1 %vm2130_vm1, %v2129_v3  ;;  %v1161_v17 = vld [vmem:[%s2544_s5 + $0x38] sm:$0xff] }
 0x11f   :  { %v417_v20 = vmax.f32 %v387_v18, %v402_v52 }
 0x121   :  { %1999 = vmatmul.mubr.msk.f32.gmra.mrb[8].mxu1 %vm427_vm2, %v414_v1 }
 0x122   :  { %2001 = vmatprep.mubr.msk.f32.mxu1 %vm2130_vm1, %v2129_v3 }
 0x125   :  { %2002 = vmatmul.mubr.msk.f32.gmra.mrb[10].mxu1 %vm427_vm2, %v415_v15 }
 0x126   :  { %2004 = vmatprep.mubr.msk.f32.mxu1 %vm2130_vm1, %v2129_v3 }
 0x129   :  { %2005 = vmatmul.mubr.msk.f32.gmra.mrb[12].mxu1 %vm427_vm2, %v416_v12  ;;  %v1086_v12 = vld [vmem:[%s2544_s5 + $0x30] sm:$0xff] }
 0x12a   :  { %2007 = vmatprep.mubr.msk.f32.mxu1 %vm2130_vm1, %v2129_v3 }
 0x12d   :  { %2008 = vmatmul.mubr.msk.f32.gmra.mrb[14].mxu1 %vm427_vm2, %v417_v20 }
 0x12e   :  { %2010 = vmatprep.mubr.msk.f32.mxu1 %vm2130_vm1, %v2129_v3 }
 0x131   :  { %2011 = vmatmul.mubr.msk.f32.gmra.mrb[16].mxu1 %vm427_vm2, %v418_v19  ;;  %v1236_v19 = vld [vmem:[%s2544_s5 + $0x40] sm:$0xff] }
 0x132   :  { %2015 = vmatprep.mubr.msk.f32.mxu1 %vm2130_vm1, %v2129_v3 }
 0x1d7   :  { %v539_v21 = vpop.f32.mrb[30].mxu0 }
 0x1d8   :  { %v540_v22 = vadd.f32 %v2419_v51, %v539_v21  ;;  %v1970_v23 = vpop.f32.mrb[31].mxu0 }
 0x1da   :  { %v613_v24 = vmax.f32 %v540_v22, 0.0  ;;  %v1386_v22 = vld [vmem:[%s2544_s5 + $0x50] sm:$0xff] }
 0x1dc   :  { %v544_v26 = vpop.f32.mrb[32].mxu0  ;;  %2016 = vmatmul.mubr.msk.f32.vlgmr.msra.gmra.mrb[18].mxu1 %vm427_vm2, %v613_v24  ;;  %v1461_v24 = vld [vmem:[%s2544_s5 + $0x58] sm:$0xff] }
 0x1dd   :  { %2019 = vmatpush3.msra.mxu1 %v711_v25  ;;  %v1973_v27 = vpop.f32.mrb[33].mxu0  ;;  %2020 = vmatprep.mubr.msk.f32.mxu1 %vm2130_vm1, %v2129_v3  ;;  %v545_v28 = vadd.f32 %v2419_v51, %v544_v26  ;;  %v1536_v26 = vld [vmem:[%s2544_s5 + $0x60] sm:$0xff] }
 0x1de   :  { %2023 = vmatprep.subr.mxu1 %v2129_v3 }
 0x1df   :  { %v614_v31 = vmax.f32 %v545_v28, 0.0  ;;  %v1611_v28 = vld [vmem:[%s2544_s5 + $0x68] sm:$0xff] }
 0x1e0   :  { %v549_v29 = vpop.f32.mrb[34].mxu0 }
 0x1e1   :  { %v1976_v30 = vpop.f32.mrb[35].mxu0  ;;  %v550_v37 = vadd.f32 %v2419_v51, %v549_v29 }
 0x1e2   :  { %v1686_v30 = vld [vmem:[%s2544_s5 + $0x70] sm:$0xff] }
 0x1e3   :  { %v569_v33 = vpop.f32.mrb[0].mxu1  ;;  %v615_v42 = vmax.f32 %v550_v37, 0.0 }
 0x1e4   :  { %v554_v34 = vpop.f32.mrb[36].mxu0  ;;  %v1988_v35 = vpop.f32.mrb[1].mxu1  ;;  %2021 = vmatmul.mubr.msk.f32.vlgmr.msra.gmra.mrb[18].mxu1 %vm427_vm2, %v614_v31  ;;  %v570_v57 = vadd.f32 %v2419_v51, %v569_v33 }
 0x1e5   :  { %2024 = vmatpush3.msra.mxu1 %v786_v32  ;;  %v1979_v36 = vpop.f32.mrb[37].mxu0  ;;  %2025 = vmatprep.mubr.msk.f32.mxu1 %vm2130_vm1, %v2129_v3  ;;  %v555_v55 = vadd.f32 %v2419_v51, %v554_v34  ;;  %v1814_v32 = vld [vmem:[%s2546_s6] ss:$0 sm:$0xff] }
 0x1e6   :  { %2028 = vmatprep.subr.mxu1 %v2129_v3  ;;  %v619_v16 = vmax.f32 %v570_v57, 0.0 }
 0x1e7   :  { %v616_v47 = vmax.f32 %v555_v55, 0.0 }
 0x1e8   :  { %v559_v38 = vpop.f32.mrb[38].mxu0  ;;  %v574_v39 = vpop.f32.mrb[2].mxu1 }
 0x1e9   :  { %v1982_v40 = vpop.f32.mrb[39].mxu0  ;;  %v1991_v41 = vpop.f32.mrb[3].mxu1  ;;  %v560_v63 = vadd.f32 %v2419_v51, %v559_v38  ;;  %v575_v18 = vadd.f32 %v2419_v51, %v574_v39 }
 0x1eb   :  { %v617_v4 = vmax.f32 %v560_v63, 0.0  ;;  %v620_v52 = vmax.f32 %v575_v18, 0.0 }
 0x1ec   :  { %v564_v44 = vpop.f32.mrb[40].mxu0  ;;  %v579_v45 = vpop.f32.mrb[4].mxu1  ;;  %2026 = vmatmul.mubr.msk.f32.vlgmr.msra.gmra.mrb[18].mxu1 %vm427_vm2, %v615_v42 }
 0x1ed   :  { %v580_v46 = vadd.f32 %v2419_v51, %v579_v45  ;;  %2029 = vmatpush3.msra.mxu1 %v861_v43  ;;  %v1985_v48 = vpop.f32.mrb[41].mxu0  ;;  %v1994_v54 = vpop.f32.mrb[5].mxu1  ;;  %2030 = vmatprep.mubr.msk.f32.mxu1 %vm2130_vm1, %v2129_v3  ;;  %v565_v7 = vadd.f32 %v2419_v51, %v564_v44 }
 0x1ee   :  { %2033 = vmatprep.subr.mxu1 %v2129_v3 }
 0x1ef   :  { %v618_v11 = vmax.f32 %v565_v7, 0.0  ;;  %v621_v20 = vmax.f32 %v580_v46, 0.0 }
 0x1f0   :  { %v584_v56 = vpop.f32.mrb[6].mxu1 }
 0x1f1   :  { %v585_v50 = vadd.f32 %v2419_v51, %v584_v56  ;;  %v1997_v58 = vpop.f32.mrb[7].mxu1 }
 0x1f3   :  { %v622_v21 = vmax.f32 %v585_v50, 0.0 }
 0x1f4   :  { %v589_v60 = vpop.f32.mrb[8].mxu1  ;;  %2031 = vmatmul.mubr.msk.f32.vlgmr.msra.gmra.mrb[18].mxu1 %vm427_vm2, %v616_v47 }
 0x1f5   :  { %v590_v61 = vadd.f32 %v2419_v51, %v589_v60  ;;  %2034 = vmatpush3.msra.mxu1 %v936_v59  ;;  %v2000_v62 = vpop.f32.mrb[9].mxu1  ;;  %2035 = vmatprep.mubr.msk.f32.mxu1 %vm2130_vm1, %v2129_v3 }
 0x1f6   :  { %2038 = vmatprep.subr.mxu1 %v2129_v3 }
 0x1f7   :  { %v623_v23 = vmax.f32 %v590_v61, 0.0 }
 0x1f8   :  { %v594_v0 = vpop.f32.mrb[10].mxu1 }
 0x1f9   :  { %v595_v1 = vadd.f32 %v2419_v51, %v594_v0  ;;  %v2003_v2 = vpop.f32.mrb[11].mxu1 }
 0x1fb   :  { %v624_v25 = vmax.f32 %v595_v1, 0.0 }
 0x1fc   :  { %v599_v5 = vpop.f32.mrb[12].mxu1  ;;  %2036 = vmatmul.mubr.msk.f32.vlgmr.msra.gmra.mrb[18].mxu1 %vm427_vm2, %v617_v4 }
 0x1fd   :  { %v600_v49 = vadd.f32 %v2419_v51, %v599_v5  ;;  %2039 = vmatpush3.msra.mxu1 %v1011_v53  ;;  %v2006_v6 = vpop.f32.mrb[13].mxu1  ;;  %2040 = vmatprep.mubr.msk.f32.mxu1 %vm2130_vm1, %v2129_v3 }
 0x1fe   :  { %2043 = vmatprep.subr.mxu1 %v2129_v3 }
 0x1ff   :  { %v625_v27 = vmax.f32 %v600_v49, 0.0 }
 0x200   :  { %v604_v8 = vpop.f32.mrb[14].mxu1 }
 0x201   :  { %v605_v9 = vadd.f32 %v2419_v51, %v604_v8  ;;  %v2009_v10 = vpop.f32.mrb[15].mxu1 }
 0x203   :  { %v626_v29 = vmax.f32 %v605_v9, 0.0 }
 0x204   :  { %v609_v13 = vpop.f32.mrb[16].mxu1  ;;  %2041 = vmatmul.mubr.msk.f32.vlgmr.msra.gmra.mrb[18].mxu1 %vm427_vm2, %v618_v11 }
 0x205   :  { %v610_v14 = vadd.f32 %v2419_v51, %v609_v13  ;;  %2044 = vmatpush3.msra.mxu1 %v1086_v12  ;;  %v2012_v15 = vpop.f32.mrb[17].mxu1  ;;  %2045 = vmatprep.mubr.msk.f32.mxu1 %vm2130_vm1, %v2129_v3  ;;  %v1311_v51 = vld [vmem:[%s2544_s5 + $0x48] sm:$0xff] }
 0x206   :  { %2048 = vmatprep.subr.mxu1 %v2129_v3 }
 0x207   :  { %v627_v31 = vmax.f32 %v610_v14, 0.0 }
 0x20c   :  { %2046 = vmatmul.mubr.msk.f32.vlgmr.msra.gmra.mrb[18].mxu1 %vm427_vm2, %v619_v16 }
 0x20d   :  { %2049 = vmatpush3.msra.mxu1 %v1161_v17  ;;  %2050 = vmatprep.mubr.msk.f32.mxu1 %vm2130_vm1, %v2129_v3 }
 0x20e   :  { %2053 = vmatprep.subr.mxu1 %v2129_v3 }
 0x214   :  { %2051 = vmatmul.mubr.msk.f32.vlgmr.msra.gmra.mrb[18].mxu1 %vm427_vm2, %v620_v52 }
 0x215   :  { %2054 = vmatpush3.msra.mxu1 %v1236_v19  ;;  %2055 = vmatprep.mubr.msk.f32.mxu1 %vm2130_vm1, %v2129_v3 }
 0x216   :  { %2058 = vmatprep.subr.mxu1 %v2129_v3 }
 0x21c   :  { %2056 = vmatmul.mubr.msk.f32.vlgmr.msra.gmra.mrb[18].mxu1 %vm427_vm2, %v621_v20 }
 0x21d   :  { %2059 = vmatpush3.msra.mxu1 %v1311_v51  ;;  %2060 = vmatprep.mubr.msk.f32.mxu1 %vm2130_vm1, %v2129_v3 }
 0x21e   :  { %2063 = vmatprep.subr.mxu1 %v2129_v3 }
 0x224   :  { %2061 = vmatmul.mubr.msk.f32.vlgmr.msra.gmra.mrb[18].mxu1 %vm427_vm2, %v622_v21 }
 0x225   :  { %2064 = vmatpush3.msra.mxu1 %v1386_v22  ;;  %2065 = vmatprep.mubr.msk.f32.mxu1 %vm2130_vm1, %v2129_v3 }
 0x226   :  { %2068 = vmatprep.subr.mxu1 %v2129_v3 }
 0x22c   :  { %2066 = vmatmul.mubr.msk.f32.vlgmr.msra.gmra.mrb[18].mxu1 %vm427_vm2, %v623_v23 }
 0x22d   :  { %2069 = vmatpush3.msra.mxu1 %v1461_v24  ;;  %2070 = vmatprep.mubr.msk.f32.mxu1 %vm2130_vm1, %v2129_v3 }
 0x22e   :  { %2073 = vmatprep.subr.mxu1 %v2129_v3 }
 0x234   :  { %2071 = vmatmul.mubr.msk.f32.vlgmr.msra.gmra.mrb[18].mxu1 %vm427_vm2, %v624_v25 }
 0x235   :  { %2074 = vmatpush3.msra.mxu1 %v1536_v26  ;;  %2075 = vmatprep.mubr.msk.f32.mxu1 %vm2130_vm1, %v2129_v3 }
 0x236   :  { %2078 = vmatprep.subr.mxu1 %v2129_v3 }
 0x23c   :  { %2076 = vmatmul.mubr.msk.f32.vlgmr.msra.gmra.mrb[18].mxu1 %vm427_vm2, %v625_v27 }
 0x23d   :  { %2079 = vmatpush3.msra.mxu1 %v1611_v28  ;;  %2080 = vmatprep.mubr.msk.f32.mxu1 %vm2130_vm1, %v2129_v3 }
 0x23e   :  { %2083 = vmatprep.subr.mxu1 %v2129_v3 }
 0x244   :  { %2081 = vmatmul.mubr.msk.f32.vlgmr.msra.gmra.mrb[18].mxu1 %vm427_vm2, %v626_v29 }
 0x245   :  { %2084 = vmatpush3.msra.mxu1 %v1686_v30  ;;  %2085 = vmatprep.mubr.msk.f32.mxu1 %vm2130_vm1, %v2129_v3 }
 0x24c   :  { %2086 = vmatmul.mubr.msk.f32.vlgmr.msra.gmra.mrb[18].mxu1 %vm427_vm2, %v627_v31 }
 0x31f   :  { %v1756_v33 = vpop.f32.mrb[18].mxu1 }
 0x320   :  { %v2098_v34 = vadd.f32 %v1814_v32, %v1756_v33  ;;  %v2087_v35 = vpop.f32.mrb[19].mxu1 }
 0x322   :  { %1762 = vst.msk [vmem:[%s2547_s7] sm:$0xff] %vm1761_vm3, %v2098_v34 }

</bundles_post_ra>
